<compile_context>
chip_gen: v7x
topology: tpu7x:2x2x1
jax: 0.10.0
libtpu: 0.0.40
codegen_flags: <defaults>
</compile_context>

<pallas_src>
import jax
import jax.numpy as jnp
from jax.experimental import pallas as pl
from jax.experimental.pallas import tpu as pltpu


def _sequential_kernel(x_ref, scale_ref, bias_ref, o_ref):
    # x_ref     : (TB, C, THW) raw pixel values (any numeric dtype, nominally 0..255)
    # scale_ref : (1,  C, 1)   fused per-channel scale = 1 / (255 * std_c)
    # bias_ref  : (1,  C, 1)   fused per-channel bias  = -mean_c / std_c
    # o_ref     : (TB, C, THW) normalized output
    x = x_ref[...].astype(jnp.float32)
    # 1. pre_tensor_transform: clamp into valid pixel range
    x = jnp.clip(x, 0.0, 255.0)
    # 2.+3. to_tensor_transform (/255) and post_tensor_transform ((x-mean)/std),
    #       fused into a single FMA with precomputed per-channel scale/bias.
    o_ref[...] = (x * scale_ref[...] + bias_ref[...]).astype(o_ref.dtype)


def _vmem_budget():
    """Generation-aware (target_block_bytes, vmem_limit_bytes)."""
    try:
        info = pltpu.get_tpu_info()
        vmem_bytes = getattr(info, "vmem_capacity_bytes", 64 * 1024 * 1024)
    except Exception:  # no TPU info available -> be conservative (v7x-sized)
        vmem_bytes = 64 * 1024 * 1024
    if vmem_bytes >= 100 * 1024 * 1024:      # v5e / v6e: 128 MiB physical VMEM
        return 8 << 20, 64 << 20
    return 4 << 20, 32 << 20                 # v7x: 64 MiB physical VMEM


def _choose_tiles(B, C, HW, in_itemsize, out_itemsize, target_block_bytes):
    """Pick (TB, THW, n_b, n_hw) so each block moves ~target_block_bytes of HBM."""
    elem_bytes = in_itemsize + out_itemsize          # in-read + out-write per element

    # ---- lane tile over the H*W axis (multiple of 128, or the full dim) ----
    full_row_bytes = C * HW * elem_bytes             # one batch row, all channels
    if full_row_bytes <= target_block_bytes:
        thw = HW                                     # whole row fits in one block
    else:
        thw = (target_block_bytes // (C * elem_bytes)) // 128 * 128
        thw = max(128, min(thw, (HW // 128) * 128 if HW >= 128 else HW))
    n_hw = pl.cdiv(HW, thw)

    # ---- batch tile (leading dim: no (8,128) constraint) -------------------
    block_row_bytes = C * thw * elem_bytes
    tb = max(1, min(B, target_block_bytes // block_row_bytes))
    if tb >= 8:
        tb = (tb // 8) * 8                           # friendlier DMA granularity
    # Keep >= 4 blocks in flight: software pipelining + both v7x TensorCores.
    while tb > 1 and pl.cdiv(B, tb) * n_hw < 4:
        tb = (tb + 1) // 2
    n_b = pl.cdiv(B, tb)
    # Degenerate single-block case (B == 1, one H*W tile): split H*W instead.
    if n_b * n_hw < 2 and thw >= 256 and thw % 256 == 0:
        thw //= 2
        n_hw = pl.cdiv(HW, thw)
    return tb, thw, n_b, n_hw


def sequential_transform(
    x_nchw,
    mean_c,
    std_c,
    *,
    out_dtype=jnp.float32,
    target_block_bytes=None,
    vmem_limit_bytes=None,
):
    """Apply the fused pre/to_tensor/post transform chain.

    x_nchw : (B, C, H, W) raw pixels. Pass raw uint8 when possible (4x less
             HBM read traffic); the cast to float happens inside the kernel.
    mean_c : (C,) per-channel mean of the [0,1]-scaled tensor
    std_c  : (C,) per-channel std
    out_dtype : jnp.float32 (default) or jnp.bfloat16 (halves HBM write traffic)
    returns (B, C, H, W) in out_dtype
    """
    B, C, H, W = x_nchw.shape
    HW = H * W

    tbb_default, vlb_default = _vmem_budget()
    if target_block_bytes is None:
        target_block_bytes = tbb_default
    if vmem_limit_bytes is None:
        vmem_limit_bytes = vlb_default

    # (B, C, H, W) -> (B, C, H*W): pure metadata reshape (trailing dims merge).
    x3d = x_nchw.reshape(B, C, HW)

    # Fused per-channel constants: C floats each, broadcast inside the kernel.
    std_f = std_c.astype(jnp.float32)
    mean_f = mean_c.astype(jnp.float32)
    scale = (1.0 / (255.0 * std_f)).reshape(1, C, 1)
    bias = (-(mean_f / std_f)).reshape(1, C, 1)

    in_item = jnp.dtype(x_nchw.dtype).itemsize
    out_item = jnp.dtype(out_dtype).itemsize
    tb, thw, n_b, n_hw = _choose_tiles(B, C, HW, in_item, out_item, target_block_bytes)

    out = pl.pallas_call(
        _sequential_kernel,
        out_shape=jax.ShapeDtypeStruct((B, C, HW), out_dtype),
        grid_spec=pltpu.PrefetchScalarGridSpec(
            num_scalar_prefetch=0,
            grid=(n_b, n_hw),
            in_specs=[
                pl.BlockSpec((tb, C, thw), lambda b, f: (b, 0, f)),
                pl.BlockSpec((1, C, 1), lambda b, f: (0, 0, 0)),
                pl.BlockSpec((1, C, 1), lambda b, f: (0, 0, 0)),
            ],
            out_specs=pl.BlockSpec((tb, C, thw), lambda b, f: (b, 0, f)),
        ),
        compiler_params=pltpu.CompilerParams(
            dimension_semantics=("parallel", "parallel"),
            vmem_limit_bytes=vmem_limit_bytes,
        ),
    )(x3d, scale, bias)

    return out.reshape(B, C, H, W)


if __name__ == "__main__":
    key = jax.random.PRNGKey(0)
    B, C, H, W = 2, 4, 16, 16

    # Raw "pixel" sample, deliberately with some out-of-range values so the
    # pre_tensor_transform (clamp) stage is exercised.
    x = jax.random.uniform(key, (B, C, H, W), jnp.float32, minval=-20.0, maxval=280.0)

    # Deterministic per-channel normalization parameters (synthetic, in-script).
    mean_c = jnp.linspace(0.4, 0.5, C, dtype=jnp.float32)
    std_c = jnp.linspace(0.2, 0.3, C, dtype=jnp.float32)

    y = sequential_transform(x, mean_c, std_c)
    y = jax.block_until_ready(y)

    # Reference (plain JAX) check of the same 3-stage chain.
    ref = (jnp.clip(x, 0.0, 255.0) / 255.0 - mean_c[None, :, None, None]) / std_c[
        None, :, None, None
    ]
    assert y.shape == (B, C, H, W) and y.dtype == jnp.float32
    assert jnp.allclose(y, ref, atol=1e-5, rtol=1e-5)

    # TODO(synk): assert_contains_tensor / MisconfigurationException is a
    # Python-side type check with no kernel equivalent; omitted.
    print("KERNEL_OK")
</pallas_src>

<mosaic_0001>
module attributes {stable_mosaic.version = 11 : i64} {
  func.func @_sequential_kernel(%arg0: i32, %arg1: i32, %arg2: memref<1x4x256xf32, #tpu.memory_space<vmem>>, %arg3: memref<1x4x1xf32, #tpu.memory_space<vmem>>, %arg4: memref<1x4x1xf32, #tpu.memory_space<vmem>>, %arg5: memref<1x4x256xf32, #tpu.memory_space<vmem>>) attributes {dimension_semantics = [#tpu.dimension_semantics<parallel>, #tpu.dimension_semantics<parallel>], iteration_bounds = array<i64: 2, 1>, scalar_prefetch = 0 : i64, scratch_operands = 0 : i64, tpu.core_type = #tpu.core_type<tc>, window_params = [{transform_indices = @transform_0, window_bounds = array<i64: 1, 4, 256>}, {pipeline_mode = #tpu.pipeline_mode<synchronous>, transform_indices = @transform_1, window_bounds = array<i64: 1, 4, 1>}, {pipeline_mode = #tpu.pipeline_mode<synchronous>, transform_indices = @transform_2, window_bounds = array<i64: 1, 4, 1>}, {transform_indices = @transform_3, window_bounds = array<i64: 1, 4, 256>}]} {
    %c0 = arith.constant 0 : index
    %c0_0 = arith.constant 0 : index
    %c0_1 = arith.constant 0 : index
    %0 = vector.load %arg2[%c0, %c0_0, %c0_1] : memref<1x4x256xf32, #tpu.memory_space<vmem>>, vector<1x4x256xf32>
    %cst = arith.constant 0.000000e+00 : f32
    %cst_2 = arith.constant 2.550000e+02 : f32
    %1 = vector.broadcast %cst : f32 to vector<1x4x256xf32>
    %2 = arith.maximumf %1, %0 : vector<1x4x256xf32>
    %3 = vector.broadcast %cst_2 : f32 to vector<1x4x256xf32>
    %4 = arith.minimumf %3, %2 : vector<1x4x256xf32>
    %c0_3 = arith.constant 0 : index
    %c0_4 = arith.constant 0 : index
    %c0_5 = arith.constant 0 : index
    %5 = vector.load %arg3[%c0_3, %c0_4, %c0_5] : memref<1x4x1xf32, #tpu.memory_space<vmem>>, vector<1x4x1xf32>
    %6 = vector.broadcast %5 : vector<1x4x1xf32> to vector<1x4x256xf32>
    %7 = arith.mulf %4, %6 : vector<1x4x256xf32>
    %c0_6 = arith.constant 0 : index
    %c0_7 = arith.constant 0 : index
    %c0_8 = arith.constant 0 : index
    %8 = vector.load %arg4[%c0_6, %c0_7, %c0_8] : memref<1x4x1xf32, #tpu.memory_space<vmem>>, vector<1x4x1xf32>
    %9 = vector.broadcast %8 : vector<1x4x1xf32> to vector<1x4x256xf32>
    %10 = arith.addf %7, %9 : vector<1x4x256xf32>
    %c0_9 = arith.constant 0 : index
    %c0_10 = arith.constant 0 : index
    %c0_11 = arith.constant 0 : index
    %11 = vector.load %arg5[%c0_9, %c0_10, %c0_11] : memref<1x4x256xf32, #tpu.memory_space<vmem>>, vector<1x4x256xf32>
    tpu.vector_store %arg5[%c0_9, %c0_10, %c0_11], %10 {strides = array<i32>} : memref<1x4x256xf32, #tpu.memory_space<vmem>>, vector<1x4x256xf32>,
    return
  }
  func.func @transform_0(%arg0: i32, %arg1: i32) -> (i32, i32, i32) {
    %c0_i32 = arith.constant 0 : i32
    %c0_i32_0 = arith.constant 0 : i32
    return %arg0, %c0_i32, %arg1 : i32, i32, i32
  }
  func.func @transform_1(%arg0: i32, %arg1: i32) -> (i32, i32, i32) {
    %c0_i32 = arith.constant 0 : i32
    %c0_i32_0 = arith.constant 0 : i32
    %c0_i32_1 = arith.constant 0 : i32
    %c0_i32_2 = arith.constant 0 : i32
    return %c0_i32, %c0_i32_0, %c0_i32_1 : i32, i32, i32
  }
  func.func @transform_2(%arg0: i32, %arg1: i32) -> (i32, i32, i32) {
    %c0_i32 = arith.constant 0 : i32
    %c0_i32_0 = arith.constant 0 : i32
    %c0_i32_1 = arith.constant 0 : i32
    %c0_i32_2 = arith.constant 0 : i32
    return %c0_i32, %c0_i32_0, %c0_i32_1 : i32, i32, i32
  }
  func.func @transform_3(%arg0: i32, %arg1: i32) -> (i32, i32, i32) {
    %c0_i32 = arith.constant 0 : i32
    %c0_i32_0 = arith.constant 0 : i32
    return %arg0, %c0_i32, %arg1 : i32, i32, i32
  }
}

</mosaic_0001>

<bundles_post_ra>
// kernel: tpu_custom_call.1
= control target key start
LH: loop header
LB: loop body
LE: loop exit
PB: predicated region body
PF: predicated region fallthrough
CT: control target
= control target key end

     0   :  { %8 = vsyncpa [#allocation3], 0  ;;  %s738_s0 = inlined_call_operand.hbm [shape: f32[2,4,256], index: 0, kind: input, shape index: {}]   ;;  %s739_s1 = inlined_call_operand.vmem [shape: f32[1,4,1], index: 1, kind: input, shape index: {}]   ;;  %s740_s2 = inlined_call_operand.vmem [shape: f32[1,4,1], index: 2, kind: input, shape index: {}]   ;;  %s741_s3 = inlined_call_operand.hbm [shape: f32[2,4,256], index: 3, kind: output, shape index: {}]  }
   0x1   :  { %10 = vsyncpa [#allocation3 + $0x1], 0 }
   0x2   :  { %11 = vsyncpa [#allocation4], 0 }
   0x3   :  { %13 = vsyncpa [#allocation4 + $0x1], 0  ;;  %s560_s12 = smov 0   ;;  %s562_s13 = smov 0  }
   0x4   :  { %s564_s14 = smov 0   ;;  %s566_s15 = smov 0  }
   0x5   :  { %s568_s16 = smov 0   ;;  %s570_s17 = smov 0  }
   0x6 LB: > { %s340_s18 = sadd.s32 4294967295, %s534_s17   ;;  %s341_s19 = sadd.s32 4294967294, %s534_s17   ;;  %s534_s17 = sphi %s570_s17, %s19_s17   ;;  %s530_s16 = sphi %s568_s16, %s757_s16   ;;  %s526_s15 = sphi %s566_s15, %s756_s15   ;;  %s522_s14 = sphi %s564_s14, %s755_s14   ;;  %s518_s13 = sphi %s562_s13, %s754_s13   ;;  %s514_s12 = sphi %s560_s12, %s753_s12  }
   0x7   : > { %s31_s20 = sadd.s32 1, %s530_s16  ;;  %s40_s21 = sadd.s32 1, %s522_s14 }
   0x8   : > { %p33_p0 = scmp.ge.s32.totalorder %s31_s20, 2  ;;  %p47_p1 = scmp.ne.s32.totalorder %s522_s14, %s518_s13 }
   0x9   : > { %p48_p2 = scmp.eq.s32.totalorder %s534_s17, 0  ;;  %p53_p3 = scmp.ne.s32.totalorder %s518_s13, %s514_s12 }
   0xa   : > { %s759_s20 = smov (%p33_p0, %s31_s20), 0  ;;  %p54_p5 = scmp.eq.s32.totalorder %s340_s18, 0 }
   0xb   : > { %p601_p4 = por %p48_p2, %p47_p1  ;;  %s35_s23 = ssub.s32 %s530_s16, %s759_s20 }
   0xc   : > { %p121_p6 = scmp.eq.s32.totalorder %s340_s18, 1  ;;  %p38_p7 = scmp.eq.s32.totalorder %s35_s23, 0 }
   0xd   : > { %p607_p8 = por %p54_p5, %p53_p3  ;;  %p127_p10 = scmp.eq.s32.totalorder %s341_s19, 1 }
   0xe   : > { %p611_p9 = por %p121_p6, %p47_p1  ;;  %p369_p13 = scmp.lt.s32.totalorder %s534_s17, 2 }
   0xf   : > { %s616_s26 = scalar_select %p38_p7, %s522_s14, %s40_s21  }
  0x10   : > { %s745_s25 = scalar_select %p611_p9, 1, 0 }
  0x11   : > { %p618_p11 = por %p127_p10, %p53_p3  ;;  %s153_s28 = sand.u32 1, %s522_s14  }
  0x12   : > { %s344_s29 = sshll.u32 %s153_s28, 3  ;;  %s355_s30 = sshll.u32 %s530_s16, 7 }
  0x13   : > { %s746_s27 = scalar_select %p618_p11, 1, 0 }
  0x14   : > { %s629_s6 = scalar_lea.hbm %s738_s0, %s355_s30  ;;  %s157_s7 = scalar_lea.vmem [#allocation2], %s344_s29 }
  0x15   : > { %s167_s8 = sshll.u32 %s157_s7, 4  ;;  %p635_p0 = pnand %p369_p13, %p601_p4  ;;  %s631_s8 = int_to_ptr.vmem [resolvable:$true] %s167_s8 }
  0x16   : > { %s154_s10 = scalar_lea.sflag [#allocation3], %s153_s28  ;;  %s422_s11 = scalar_lea.hbm %s629_s6, 128 }
  0x17   : > { %p423_p3 = scmp.ne.s32.totalorder %s629_s6, %s422_s11  ;;  %p424_p5 = pneg %p635_p0 }
  0x18   : > { %s427_s21 = scalar_lea.hbm %s738_s0, 256  ;;  %p428_p4 = scmp.lt.u32.totalorder %s629_s6, %s738_s0 }
  0x19   : > { %p425_p6 = pnand %p424_p5, %p423_p3  ;;  %p429_p10 = scmp.lt.u32.totalorder %s427_s21, %s422_s11 }
  0x1a   : > { %p431_p12 = scmp.lt.u32.totalorder %s422_s11, %s629_s6 }
  0x1b   : > { %p426_p7 = pneg %p425_p6  ;;  %p430_p13 = por %p429_p10, %p428_p4 }
  0x1d   : > { %p432_p1 = por %p431_p12, %p430_p13 }
  0x1f   : > { %p433_p2 = pnand %p432_p1, %p426_p7 }
  0x21   : > { %436 = shalt.err (!%p433_p2)
}
  0x22   : > { %s437_s28 = scalar_lea.vmem %s631_s8, 128  ;;  %s536_s29 = smov [#allocation2]  }
  0x23   : > { %p438_p3 = scmp.ne.s32.totalorder %s631_s8, %s437_s28  ;;  %s442_s30 = sshll.u32 %s536_s29, 4  ;;  %s443_s30 = int_to_ptr.vmem [resolvable:$false] %s442_s30 }
  0x24   : > { %s444_s4 = scalar_lea.vmem %s443_s30, 256  ;;  %p445_p9 = scmp.lt.s32.totalorder %s631_s8, %s443_s30 }
  0x25   : > { %p440_p6 = pnand %p438_p3, %p424_p5  ;;  %p446_p4 = scmp.lt.s32.totalorder %s444_s4, %s437_s28 }
  0x27   : > { %p441_p11 = pneg %p440_p6  ;;  %p447_p10 = por %p446_p4, %p445_p9 }
  0x29   : > { %p448_p12 = pnand %p447_p10, %p441_p11 }
  0x2b   : > { %451 = shalt.err (!%p448_p12)
}
  0x2c   : > { %364 = dma.hbm_to_vmem [thread:$0]  (!%p635_p0), %s629_s6, 128, %s631_s8, %s154_s10  }
  0x2d   : > { %p748_p1 = scmp.lt.s32.totalorder %s534_s17, 3  ;;  %p749_p2 = scmp.ge.s32.totalorder %s534_s17, 1 }
  0x2f   : > { %p173_p5 = pnand %p749_p2, %p748_p1 }
  0x30   : > { %s671_s5 = sand.u32 (!%p173_p5), 1, %s518_s13  }
  0x31   : > { %176 = sbr.rel (%p173_p5) target bundleno = 209 (0xd1), region = 32  ;;  %s348_s7 = sshll.u32 (!%p173_p5), %s671_s5, 3 }
  0x32   : > { %s179_s11 = scalar_lea.sflag (!%p173_p5), [#allocation3], %s671_s5  ;;  %s182_s18 = scalar_lea.vmem (!%p173_p5), [#allocation2], %s348_s7 }
  0x38   : > { %505 = dma.done.wait (%p607_p8), %s179_s11, 128  }
  0x39   : > { %507 = vsyncadd (%p607_p8), %s179_s11, 4294967168  ;;  %v537_v0 = vmov 0   ;;  %v210_v1 = vld [vmem:[%s739_s1] sm:$0xf]  ;;  %v538_v3 = vmov 839922192   ;;  %v218_v5 = vlaneseq }
  0x3a   : > { %421 = vset.pattern.permute.xlu0 %v537_v0  ;;  %v224_v2 = vld [vmem:[%s740_s2] sm:$0xf]  ;;  %v216_v4 = vunpack.c.l.s4 %v538_v3  ;;  %s356_s24 = sshll.u32 %s526_s15, 7  ;;  %s204_s19 = scalar_lea.vmem [#allocation5], %s348_s7 }
  0x3b   : > { %213 = vperm.xlu0 %421, %v210_v1   ;;  %v219_v7 = vshrl.u32 %v218_v5, 7  ;;  %v207_v8 = vld [vmem:[%s182_s18] sm:$0xff]  ;;  %s256_s21 = sshll.u32 %s204_s19, 4  ;;  %s689_s28 = scalar_lea.hbm %s741_s3, %s356_s24  ;;  %s691_s21 = int_to_ptr.vmem [resolvable:$true] %s256_s21 }
  0x3c   : > { %v217_v6 = vunpack.c.0.s8 %v216_v4  ;;  %v208_v10 = vmax.f32 %v207_v8, 0.0  ;;  %s240_s29 = scalar_lea.sflag [#allocation4], %s671_s5  ;;  %s452_s30 = scalar_lea.vmem %s691_s21, 128 }
  0x3d   : > { %p453_p8 = scmp.ne.s32.totalorder %s691_s21, %s452_s30  ;;  %p750_p9 = scmp.ne.s32.totalorder %s745_s25, 0 }
  0x3e   : > { %v220_v9 = vsub.s32 %v217_v6, %v219_v7  ;;  %v209_v12 = vmin.f32 %v208_v10, 255.0  ;;  %s539_s15 = smov [#allocation5]  }
  0x3f   : > { %227 = vperm.xlu0 %421, %v224_v2   ;;  %p454_p11 = pnand %p453_p8, %p750_p9  ;;  %s456_s4 = sshll.u32 %s539_s15, 4  ;;  %s457_s4 = int_to_ptr.vmem [resolvable:$false] %s456_s4 }
  0x40   : > { %s458_s7 = scalar_lea.vmem %s457_s4, 256  ;;  %p459_p7 = scmp.lt.s32.totalorder %s691_s21, %s457_s4 }
  0x41   : > { %p455_p0 = pneg %p454_p11  ;;  %p460_p13 = scmp.lt.s32.totalorder %s458_s7, %s452_s30 }
  0x43   : > { %p461_p3 = por %p460_p13, %p459_p7 }
  0x45   : > { %p462_p6 = pnand %p461_p3, %p455_p0 }
  0xba   : > { %v214_v11 = vpop.permute.xlu0 %213 }
  0xbb   : > { %v221_v13 = vrot.slane %v214_v11, %v220_v9 }
  0xbd   : > { %v223_v15 = vmul.f32 %v221_v13, %v209_v12 }
  0xbe   : > { %v228_v14 = vpop.permute.xlu0 %227 }
  0xbf   : > { %v235_v16 = vrot.slane %v228_v14, %v220_v9 }
  0xc1   : > { %v237_v17 = vadd.f32 %v235_v16, %v223_v15 }
  0xc3   : > { %238 = vst [vmem:[%s204_s19] sm:$0xff] %v237_v17 }
  0xc4   : > { %465 = shalt.err (!%p462_p6)
}
  0xc5   : > { %s466_s5 = scalar_lea.hbm %s689_s28, 128  ;;  %s470_s6 = scalar_lea.hbm %s741_s3, 256 }
  0xc6   : > { %p467_p4 = scmp.ne.s32.totalorder %s689_s28, %s466_s5  ;;  %p471_p1 = scmp.lt.u32.totalorder %s689_s28, %s741_s3 }
  0xc7   : > { %p472_p2 = scmp.lt.u32.totalorder %s470_s6, %s466_s5  ;;  %p474_p8 = scmp.lt.u32.totalorder %s466_s5, %s689_s28 }
  0xc8   : > { %p468_p10 = pnand %p467_p4, %p750_p9 }
  0xc9   : > { %p473_p5 = por %p472_p2, %p471_p1 }
  0xca   : > { %p469_p12 = pneg %p468_p10 }
  0xcb   : > { %p475_p11 = por %p474_p8, %p473_p5 }
  0xcd   : > { %p476_p0 = pnand %p475_p11, %p469_p12 }
  0xcf   : > { %479 = shalt.err (!%p476_p0)
}
  0xd0   : > { %359 = dma.vmem_to_hbm [thread:$0]  (%p750_p9), %s691_s21, 128, %s689_s28, %s240_s29  }
  0xd1 PF: > { %s268_s10 = sand.u32 1, %s514_s12   ;;  %p751_p7 = scmp.ne.s32.totalorder %s746_s27, 0 }
  0xd2   : > { %p752_p13 = scmp.ge.s32.totalorder %s534_s17, 2  ;;  %s269_s24 = scalar_lea.sflag [#allocation4], %s268_s10 }
  0xd4   : > { %p366_p3 = pnand %p752_p13, %p751_p7 }
  0xd6   : > { %509 = dma.done.wait (!%p366_p3), %s269_s24, 128  }
  0xd7   : > { %511 = vsyncadd (!%p366_p3), %s269_s24, 4294967168  ;;  %s19_s17 = sadd.s32 1, %s534_s17   ;;  %s753_s12 = smov %s518_s13 }
  0xd8   : > { %p16_p6 = scmp.ge.s32.totalorder %s19_s17, 4   ;;  %s754_s13 = smov %s522_s14 }
  0xd9   : > { %s755_s14 = smov %s616_s26  ;;  %s756_s15 = smov %s530_s16 }
  0xda   : > { %s757_s16 = smov %s759_s20  ;;  %18 = sbr.rel (!%p16_p6) target bundleno = 6 (0x6), region = 77 }
  0xe1   :  { %274 = vsyncpa [#allocation3], 1 }
  0xe2   :  { %276 = vsyncpa [#allocation3 + $0x1], 1 }
  0xe3   :  { %277 = vsyncpa [#allocation4], 1 }
  0xe4   :  { %279 = vsyncpa [#allocation4 + $0x1], 1 }

</bundles_post_ra>
